<compile_context>
chip_gen: v7x
topology: tpu7x:2x2x1
jax: 0.10.0
libtpu: 0.0.40
codegen_flags: <defaults>
</compile_context>

<pallas_src>
import functools
import math

import jax
import jax.numpy as jnp
from jax import lax
from jax.experimental import pallas as pl
from jax.experimental.pallas import tpu as pltpu

SMOOTH_NR = 1e-5  # MONAI DiceLoss defaults
SMOOTH_DR = 1e-5
LANES = 128


def _dice_ce_kernel(x_ref, lab_ref, inter_ref, denom_ref, ce_ref, *, C):
    t = pl.program_id(2)

    @pl.when(t == 0)
    def _():
        inter_ref[...] = jnp.zeros_like(inter_ref)
        denom_ref[...] = jnp.zeros_like(denom_ref)
        ce_ref[...] = jnp.zeros_like(ce_ref)

    x = x_ref[0].astype(jnp.float32)        # (C, TB, 128) logits tile (cast per-tile)
    labels = lab_ref[0].astype(jnp.int32)   # (TB, 128) class ids (-1 sentinel in padding)

    # Softmax over the class axis (outer dim) -> pure element-wise VPU work.
    m = jnp.max(x, axis=0)                  # (TB, 128)
    e = jnp.exp(x - m[None])                # (C, TB, 128)
    z = jnp.sum(e, axis=0)                  # (TB, 128)
    inv_z = pl.reciprocal(z)                # exact reciprocal (keeps 1e-5 agreement)
    p = e * inv_z[None]                     # softmax probs

    # One-hot target (to_onehot_y) from a tiny (C,1,1) iota broadcast against labels.
    # Out-of-range labels (contract violation) simply produce an all-zero one-hot.
    cls = lax.broadcasted_iota(jnp.int32, (C, 1, 1), 0)
    oh = (cls == labels[None]).astype(jnp.float32)   # (C, TB, 128)

    # Cross-entropy per pixel without materializing log_softmax:
    #   -log_softmax[label] = m + log(z) - x[label]
    x_lab = jnp.sum(oh * x, axis=0)                  # (TB, 128)
    ce_pix = (m + jnp.log(z)) - x_lab                # (TB, 128)

    # Lane-wide partial sums (sublane reduce only); accumulate directly into the
    # resident output blocks (same block index across t => standard P3 accumulator).
    inter_ref[0, 0] += jnp.sum(oh * p, axis=1)                # (C, 128)
    denom_ref[0, 0] += jnp.sum(oh + p, axis=1)                # (C, 128)
    ce_ref[0, 0] += jnp.sum(ce_pix, axis=0, keepdims=True)    # (1, 128)


def _vmem_budget_bytes():
    """Returns (tile working-set budget, vmem_limit_bytes) sized for this TPU."""
    try:
        cap = int(pltpu.get_tpu_info().vmem_capacity_bytes)
    except Exception:
        cap = 64 * 1024 * 1024                      # unknown -> assume v7x-like (safe)
    if cap >= 100 * 1024 * 1024:                    # v5e / v6e: 128 MiB physical VMEM
        return 48 * 1024 * 1024, 96 * 1024 * 1024
    return 24 * 1024 * 1024, 32 * 1024 * 1024       # v7x: 64 MiB per TensorCore


def _pick_tile_rows(rows, C, in_bytes, budget_bytes):
    """Pick spatial tile rows: big blocks (amortize ~0.35us/step), VMEM-bounded,
    multiple of 32 (covers f32/bf16/int8 sublane tiling), preferring divisors of
    `rows` so no padded copy of the logits is needed."""
    # double-buffered logits block + ~10 full-tile f32 intermediates staged in VMEM
    per_row = C * LANES * (10 * 4 + 2 * in_bytes)
    tb_max = max(32, (budget_bytes // per_row) // 32 * 32)
    tb_max = min(tb_max, 2048)
    if rows <= tb_max:
        return rows                       # single full-extent block, never padded
    for cand in range(tb_max, 31, -32):   # largest tb <= tb_max dividing rows
        if rows % cand == 0:
            return cand
    return tb_max                         # ragged tail; handled by sentinel padding


def dice_ce_loss(y_pred, y_true, *, tile_rows=None):
    """y_pred: [N, C, H, W] logits (native dtype); y_true: [N, 1, H, W] labels in [0, C)."""
    N, C, H, W = y_pred.shape
    S = H * W
    rows = pl.cdiv(S, LANES)

    budget, vmem_limit = _vmem_budget_bytes()
    if tile_rows is None:
        tb = _pick_tile_rows(rows, C, y_pred.dtype.itemsize, budget)
    else:
        tb = rows if tile_rows >= rows else max(32, (tile_rows // 32) * 32)

    rows_pad = pl.cdiv(rows, tb) * tb
    s_pad = rows_pad * LANES
    pad = s_pad - S

    lab_dtype = jnp.int8 if C <= 127 else jnp.int32   # int8 would wrap class ids > 127

    x = y_pred.reshape(N, C, S)                       # native dtype (no wrapper upcast)
    lab = y_true.reshape(N, S).astype(lab_dtype)
    if pad:
        # TODO(synk): ragged tails materialize a padded logits copy; tb is chosen to
        # divide `rows` whenever possible so this path is rarely taken.
        x = jnp.pad(x, ((0, 0), (0, 0), (0, pad)))                  # zero logits
        lab = jnp.pad(lab, ((0, 0), (0, pad)), constant_values=-1)  # sentinel class
    x = x.reshape(N, C, rows_pad, LANES)
    lab = lab.reshape(N, rows_pad, LANES)

    num_tiles = rows_pad // tb
    # Extra "parallel" axis over spatial chunks so both v7x TensorCores work when N==1.
    n_chunks = 2 if (N == 1 and num_tiles % 2 == 0 and num_tiles >= 2) else 1
    tpc = num_tiles // n_chunks

    kernel = functools.partial(_dice_ce_kernel, C=C)

    inter, denom, ce = pl.pallas_call(
        kernel,
        out_shape=(
            jax.ShapeDtypeStruct((N, n_chunks, C, LANES), jnp.float32),  # intersection partials
            jax.ShapeDtypeStruct((N, n_chunks, C, LANES), jnp.float32),  # pred+gt partials
            jax.ShapeDtypeStruct((N, n_chunks, 1, LANES), jnp.float32),  # CE partials
        ),
        grid_spec=pltpu.PrefetchScalarGridSpec(
            num_scalar_prefetch=0,
            grid=(N, n_chunks, tpc),
            in_specs=[
                pl.BlockSpec((1, C, tb, LANES), lambda n, c, t: (n, 0, c * tpc + t, 0)),
                pl.BlockSpec((1, tb, LANES), lambda n, c, t: (n, c * tpc + t, 0)),
            ],
            out_specs=[
                pl.BlockSpec((1, 1, C, LANES), lambda n, c, t: (n, c, 0, 0)),
                pl.BlockSpec((1, 1, C, LANES), lambda n, c, t: (n, c, 0, 0)),
                pl.BlockSpec((1, 1, 1, LANES), lambda n, c, t: (n, c, 0, 0)),
            ],
        ),
        compiler_params=pltpu.CompilerParams(
            dimension_semantics=("parallel", "parallel", "arbitrary"),
            vmem_limit_bytes=vmem_limit,
        ),
    )(x, lab)

    # Tiny cross-lane/chunk collapse + dice nonlinearity + normalization in plain JAX.
    inter_nc = jnp.sum(inter, axis=(1, 3))   # (N, C)
    denom_nc = jnp.sum(denom, axis=(1, 3))   # (N, C)
    ce_sum = jnp.sum(ce)

    if pad:
        # Padded pixels have logits == 0 and label == -1, so oh == 0, p == 1/C per
        # class and ce_pix == log(C): remove those closed-form contributions here.
        denom_nc = denom_nc - pad / C
        ce_sum = ce_sum - N * pad * math.log(C)

    dice = jnp.mean(1.0 - (2.0 * inter_nc + SMOOTH_NR) / (denom_nc + SMOOTH_DR))
    ce_mean = ce_sum / (N * S)
    return dice + ce_mean


def _reference(y_pred, y_true):
    """Pure-JAX reference mirroring MONAI DiceLoss + torch CrossEntropyLoss."""
    N, C, H, W = y_pred.shape
    logits = y_pred.astype(jnp.float32)
    labels = y_true.reshape(N, H, W).astype(jnp.int32)

    log_sm = jax.nn.log_softmax(logits, axis=1)
    probs = jnp.exp(log_sm)
    oh = jax.nn.one_hot(labels, C, dtype=jnp.float32).transpose(0, 3, 1, 2)

    inter = jnp.sum(oh * probs, axis=(2, 3))
    denom = jnp.sum(oh, axis=(2, 3)) + jnp.sum(probs, axis=(2, 3))
    dice = jnp.mean(1.0 - (2.0 * inter + SMOOTH_NR) / (denom + SMOOTH_DR))

    ce = jnp.mean(jnp.sum(oh * (-log_sm), axis=1))
    return dice + ce


if __name__ == "__main__":
    key = jax.random.PRNGKey(0)
    k1, k2 = jax.random.split(key)
    N, C, H, W = 2, 4, 16, 16
    y_pred = jax.random.normal(k1, (N, C, H, W), dtype=jnp.float32)
    y_true = jax.random.randint(k2, (N, 1, H, W), 0, C, dtype=jnp.int32)

    loss = jax.block_until_ready(dice_ce_loss(y_pred, y_true))
    ref = jax.block_until_ready(_reference(y_pred, y_true))

    assert jnp.allclose(loss, ref, rtol=1e-5, atol=1e-5), (loss, ref)
    print("KERNEL_OK")
</pallas_src>

<mosaic_0001>
module attributes {stable_mosaic.version = 11 : i64} {
  func.func @_dice_ce_kernel(%arg0: i32, %arg1: i32, %arg2: i32, %arg3: memref<1x4x2x128xf32, #tpu.memory_space<vmem>>, %arg4: memref<1x2x128xi8, #tpu.memory_space<vmem>>, %arg5: memref<1x1x4x128xf32, #tpu.memory_space<vmem>>, %arg6: memref<1x1x4x128xf32, #tpu.memory_space<vmem>>, %arg7: memref<1x1x1x128xf32, #tpu.memory_space<vmem>>) attributes {dimension_semantics = [#tpu.dimension_semantics<parallel>, #tpu.dimension_semantics<parallel>, #tpu.dimension_semantics<arbitrary>], iteration_bounds = array<i64: 2, 1, 1>, scalar_prefetch = 0 : i64, scratch_operands = 0 : i64, tpu.core_type = #tpu.core_type<tc>, window_params = [{transform_indices = @transform_0, window_bounds = array<i64: 1, 4, 2, 128>}, {transform_indices = @transform_1, window_bounds = array<i64: 1, 2, 128>}, {transform_indices = @transform_2, window_bounds = array<i64: 1, 1, 4, 128>}, {transform_indices = @transform_3, window_bounds = array<i64: 1, 1, 4, 128>}, {transform_indices = @transform_4, window_bounds = array<i64: 1, 1, 1, 128>}]} {
    %c0_i32 = arith.constant 0 : i32
    %0 = arith.cmpi eq, %arg2, %c0_i32 : i32
    %1 = arith.extui %0 : i1 to i32
    %c0_i32_0 = arith.constant 0 : i32
    %2 = arith.cmpi ne, %1, %c0_i32_0 : i32
    scf.if %2 {
      %cst_36 = arith.constant 0.000000e+00 : f32
      %54 = vector.broadcast %cst_36 : f32 to vector<1x1x4x128xf32>
      %c0_37 = arith.constant 0 : index
      %c0_38 = arith.constant 0 : index
      %c0_39 = arith.constant 0 : index
      %c0_40 = arith.constant 0 : index
      %55 = vector.load %arg5[%c0_37, %c0_38, %c0_39, %c0_40] : memref<1x1x4x128xf32, #tpu.memory_space<vmem>>, vector<1x1x4x128xf32>
      tpu.vector_store %arg5[%c0_37, %c0_38, %c0_39, %c0_40], %54 {strides = array<i32>} : memref<1x1x4x128xf32, #tpu.memory_space<vmem>>, vector<1x1x4x128xf32>,
      %cst_41 = arith.constant 0.000000e+00 : f32
      %56 = vector.broadcast %cst_41 : f32 to vector<1x1x4x128xf32>
      %c0_42 = arith.constant 0 : index
      %c0_43 = arith.constant 0 : index
      %c0_44 = arith.constant 0 : index
      %c0_45 = arith.constant 0 : index
      %57 = vector.load %arg6[%c0_42, %c0_43, %c0_44, %c0_45] : memref<1x1x4x128xf32, #tpu.memory_space<vmem>>, vector<1x1x4x128xf32>
      tpu.vector_store %arg6[%c0_42, %c0_43, %c0_44, %c0_45], %56 {strides = array<i32>} : memref<1x1x4x128xf32, #tpu.memory_space<vmem>>, vector<1x1x4x128xf32>,
      %cst_46 = arith.constant 0.000000e+00 : f32
      %58 = vector.broadcast %cst_46 : f32 to vector<1x1x1x128xf32>
      %c0_47 = arith.constant 0 : index
      %c0_48 = arith.constant 0 : index
      %c0_49 = arith.constant 0 : index
      %c0_50 = arith.constant 0 : index
      %59 = vector.load %arg7[%c0_47, %c0_48, %c0_49, %c0_50] : memref<1x1x1x128xf32, #tpu.memory_space<vmem>>, vector<1x1x1x128xf32>
      tpu.vector_store %arg7[%c0_47, %c0_48, %c0_49, %c0_50], %58 {strides = array<i32>} : memref<1x1x1x128xf32, #tpu.memory_space<vmem>>, vector<1x1x1x128xf32>,
    } else {
    }
    %c0 = arith.constant 0 : index
    %c0_1 = arith.constant 0 : index
    %c0_2 = arith.constant 0 : index
    %c0_3 = arith.constant 0 : index
    %3 = vector.load %arg3[%c0, %c0_1, %c0_2, %c0_3] : memref<1x4x2x128xf32, #tpu.memory_space<vmem>>, vector<1x4x2x128xf32>
    %4 = vector.shape_cast %3 : vector<1x4x2x128xf32> to vector<4x2x128xf32>
    %c0_4 = arith.constant 0 : index
    %c0_5 = arith.constant 0 : index
    %c0_6 = arith.constant 0 : index
    %5 = vector.load %arg4[%c0_4, %c0_5, %c0_6] : memref<1x2x128xi8, #tpu.memory_space<vmem>>, vector<1x2x128xi8>
    %6 = vector.shape_cast %5 : vector<1x2x128xi8> to vector<2x128xi8>
    %7 = arith.extsi %6 : vector<2x128xi8> to vector<2x128xi32>
    %cst = arith.constant dense<0xFF800000> : vector<2x128xf32>
    %8 = vector.multi_reduction <maximumf>, %4, %cst [0] : vector<4x2x128xf32> to vector<2x128xf32>
    %9 = vector.shape_cast %8 : vector<2x128xf32> to vector<1x2x128xf32>
    %10 = vector.broadcast %9 : vector<1x2x128xf32> to vector<4x2x128xf32>
    %11 = arith.subf %4, %10 : vector<4x2x128xf32>
    %12 = math.exp %11 : vector<4x2x128xf32>
    %cst_7 = arith.constant dense<0.000000e+00> : vector<2x128xf32>
    %13 = vector.multi_reduction <add>, %12, %cst_7 [0] : vector<4x2x128xf32> to vector<2x128xf32>
    %14 = tpu.reciprocal %13 : vector<2x128xf32> -> vector<2x128xf32>
    %15 = vector.shape_cast %14 : vector<2x128xf32> to vector<1x2x128xf32>
    %16 = vector.broadcast %15 : vector<1x2x128xf32> to vector<4x2x128xf32>
    %17 = arith.mulf %12, %16 : vector<4x2x128xf32>
    %18 = tpu.iota {dimensions = array<i32: 0>} : vector<4x1x1xi32>
    %19 = vector.shape_cast %7 : vector<2x128xi32> to vector<1x2x128xi32>
    %20 = vector.broadcast %18 : vector<4x1x1xi32> to vector<4x2x128xi32>
    %21 = vector.broadcast %19 : vector<1x2x128xi32> to vector<4x2x128xi32>
    %22 = arith.cmpi eq, %20, %21 : vector<4x2x128xi32>
    %23 = arith.extui %22 : vector<4x2x128xi1> to vector<4x2x128xi32>
    %24 = arith.sitofp %23 : vector<4x2x128xi32> to vector<4x2x128xf32>
    %25 = arith.mulf %24, %4 : vector<4x2x128xf32>
    %cst_8 = arith.constant dense<0.000000e+00> : vector<2x128xf32>
    %26 = vector.multi_reduction <add>, %25, %cst_8 [0] : vector<4x2x128xf32> to vector<2x128xf32>
    %27 = math.log %13 : vector<2x128xf32>
    %28 = arith.addf %8, %27 : vector<2x128xf32>
    %29 = arith.subf %28, %26 : vector<2x128xf32>
    %c0_9 = arith.constant 0 : index
    %c0_10 = arith.constant 0 : index
    %c0_11 = arith.constant 0 : index
    %c0_12 = arith.constant 0 : index
    %30 = vector.load %arg5[%c0_9, %c0_10, %c0_11, %c0_12] : memref<1x1x4x128xf32, #tpu.memory_space<vmem>>, vector<1x1x4x128xf32>
    %31 = vector.shape_cast %30 : vector<1x1x4x128xf32> to vector<4x128xf32>
    %32 = arith.mulf %24, %17 : vector<4x2x128xf32>
    %cst_13 = arith.constant dense<0.000000e+00> : vector<4x128xf32>
    %33 = vector.multi_reduction <add>, %32, %cst_13 [1] : vector<4x2x128xf32> to vector<4x128xf32>
    %34 = arith.addf %31, %33 : vector<4x128xf32>
    %c0_14 = arith.constant 0 : index
    %c0_15 = arith.constant 0 : index
    %c0_16 = arith.constant 0 : index
    %c0_17 = arith.constant 0 : index
    %35 = vector.load %arg5[%c0_14, %c0_15, %c0_16, %c0_17] : memref<1x1x4x128xf32, #tpu.memory_space<vmem>>, vector<1x1x4x128xf32>
    %36 = vector.shape_cast %35 : vector<1x1x4x128xf32> to vector<4x128xf32>
    %37 = vector.shape_cast %34 : vector<4x128xf32> to vector<1x1x4x128xf32>
    tpu.vector_store %arg5[%c0_14, %c0_15, %c0_16, %c0_17], %37 {strides = array<i32>} : memref<1x1x4x128xf32, #tpu.memory_space<vmem>>, vector<1x1x4x128xf32>,
    %c0_18 = arith.constant 0 : index
    %c0_19 = arith.constant 0 : index
    %c0_20 = arith.constant 0 : index
    %c0_21 = arith.constant 0 : index
    %38 = vector.load %arg6[%c0_18, %c0_19, %c0_20, %c0_21] : memref<1x1x4x128xf32, #tpu.memory_space<vmem>>, vector<1x1x4x128xf32>
    %39 = vector.shape_cast %38 : vector<1x1x4x128xf32> to vector<4x128xf32>
    %40 = arith.addf %24, %17 : vector<4x2x128xf32>
    %cst_22 = arith.constant dense<0.000000e+00> : vector<4x128xf32>
    %41 = vector.multi_reduction <add>, %40, %cst_22 [1] : vector<4x2x128xf32> to vector<4x128xf32>
    %42 = arith.addf %39, %41 : vector<4x128xf32>
    %c0_23 = arith.constant 0 : index
    %c0_24 = arith.constant 0 : index
    %c0_25 = arith.constant 0 : index
    %c0_26 = arith.constant 0 : index
    %43 = vector.load %arg6[%c0_23, %c0_24, %c0_25, %c0_26] : memref<1x1x4x128xf32, #tpu.memory_space<vmem>>, vector<1x1x4x128xf32>
    %44 = vector.shape_cast %43 : vector<1x1x4x128xf32> to vector<4x128xf32>
    %45 = vector.shape_cast %42 : vector<4x128xf32> to vector<1x1x4x128xf32>
    tpu.vector_store %arg6[%c0_23, %c0_24, %c0_25, %c0_26], %45 {strides = array<i32>} : memref<1x1x4x128xf32, #tpu.memory_space<vmem>>, vector<1x1x4x128xf32>,
    %c0_27 = arith.constant 0 : index
    %c0_28 = arith.constant 0 : index
    %c0_29 = arith.constant 0 : index
    %c0_30 = arith.constant 0 : index
    %46 = vector.load %arg7[%c0_27, %c0_28, %c0_29, %c0_30] : memref<1x1x1x128xf32, #tpu.memory_space<vmem>>, vector<1x1x1x128xf32>
    %47 = vector.shape_cast %46 : vector<1x1x1x128xf32> to vector<1x128xf32>
    %cst_31 = arith.constant dense<0.000000e+00> : vector<128xf32>
    %48 = vector.multi_reduction <add>, %29, %cst_31 [0] : vector<2x128xf32> to vector<128xf32>
    %49 = vector.shape_cast %48 : vector<128xf32> to vector<1x128xf32>
    %50 = arith.addf %47, %49 : vector<1x128xf32>
    %c0_32 = arith.constant 0 : index
    %c0_33 = arith.constant 0 : index
    %c0_34 = arith.constant 0 : index
    %c0_35 = arith.constant 0 : index
    %51 = vector.load %arg7[%c0_32, %c0_33, %c0_34, %c0_35] : memref<1x1x1x128xf32, #tpu.memory_space<vmem>>, vector<1x1x1x128xf32>
    %52 = vector.shape_cast %51 : vector<1x1x1x128xf32> to vector<1x128xf32>
    %53 = vector.shape_cast %50 : vector<1x128xf32> to vector<1x1x1x128xf32>
    tpu.vector_store %arg7[%c0_32, %c0_33, %c0_34, %c0_35], %53 {strides = array<i32>} : memref<1x1x1x128xf32, #tpu.memory_space<vmem>>, vector<1x1x1x128xf32>,
    return
  }
  func.func @transform_0(%arg0: i32, %arg1: i32, %arg2: i32) -> (i32, i32, i32, i32) {
    %c1_i32 = arith.constant 1 : i32
    %0 = arith.muli %arg1, %c1_i32 : i32
    %1 = arith.addi %0, %arg2 : i32
    %c0_i32 = arith.constant 0 : i32
    %c0_i32_0 = arith.constant 0 : i32
    %c0_i32_1 = arith.constant 0 : i32
    return %arg0, %c0_i32, %1, %c0_i32_0 : i32, i32, i32, i32
  }
  func.func @transform_1(%arg0: i32, %arg1: i32, %arg2: i32) -> (i32, i32, i32) {
    %c1_i32 = arith.constant 1 : i32
    %0 = arith.muli %arg1, %c1_i32 : i32
    %1 = arith.addi %0, %arg2 : i32
    %c0_i32 = arith.constant 0 : i32
    %c0_i32_0 = arith.constant 0 : i32
    return %arg0, %1, %c0_i32 : i32, i32, i32
  }
  func.func @transform_2(%arg0: i32, %arg1: i32, %arg2: i32) -> (i32, i32, i32, i32) {
    %c0_i32 = arith.constant 0 : i32
    %c0_i32_0 = arith.constant 0 : i32
    %c0_i32_1 = arith.constant 0 : i32
    return %arg0, %arg1, %c0_i32, %c0_i32_0 : i32, i32, i32, i32
  }
  func.func @transform_3(%arg0: i32, %arg1: i32, %arg2: i32) -> (i32, i32, i32, i32) {
    %c0_i32 = arith.constant 0 : i32
    %c0_i32_0 = arith.constant 0 : i32
    %c0_i32_1 = arith.constant 0 : i32
    return %arg0, %arg1, %c0_i32, %c0_i32_0 : i32, i32, i32, i32
  }
  func.func @transform_4(%arg0: i32, %arg1: i32, %arg2: i32) -> (i32, i32, i32, i32) {
    %c0_i32 = arith.constant 0 : i32
    %c0_i32_0 = arith.constant 0 : i32
    %c0_i32_1 = arith.constant 0 : i32
    return %arg0, %arg1, %c0_i32, %c0_i32_0 : i32, i32, i32, i32
  }
}

</mosaic_0001>

<bundles_post_ra>
// kernel: tpu_custom_call.1
= control target key start
LH: loop header
LB: loop body
LE: loop exit
PB: predicated region body
PF: predicated region fallthrough
CT: control target
= control target key end

     0   :  { %10 = vsyncpa [#allocation3], 0  ;;  %s1293_s0 = inlined_call_operand.hbm [shape: f32[2,4,2,128], index: 0, kind: input, shape index: {}]   ;;  %s1294_s1 = inlined_call_operand.vmem [shape: s8[2,2,128], index: 1, kind: input, shape index: {}]   ;;  %s1295_s2 = inlined_call_operand.hbm [shape: f32[2,1,4,128], index: 2, kind: output, shape index: {0}]   ;;  %s1296_s3 = inlined_call_operand.hbm [shape: f32[2,1,4,128], index: 3, kind: output, shape index: {1}]   ;;  %s1297_s4 = inlined_call_operand.hbm [shape: f32[2,1,1,128], index: 4, kind: output, shape index: {2}]  }
   0x1   :  { %12 = vsyncpa [#allocation3 + $0x1], 0 }
   0x2   :  { %13 = vsyncpa [#allocation4], 0 }
   0x3   :  { %15 = vsyncpa [#allocation4 + $0x1], 0 }
   0x4   :  { %16 = vsyncpa [#allocation7], 0 }
   0x5   :  { %18 = vsyncpa [#allocation7 + $0x1], 0  ;;  %s992_s15 = smov 0   ;;  %s994_s16 = smov 0  }
   0x6   :  { %s996_s17 = smov 0   ;;  %s998_s18 = smov 0  }
   0x7   :  { %s1000_s19 = smov 0   ;;  %s1002_s20 = smov 0  }
   0x8 LB: > { %s1023_s21 = sadd.s32 4294967295, %s958_s20   ;;  %s1299_s22 = sadd.s32 4294967294, %s958_s20   ;;  %s958_s20 = sphi %s1002_s20, %s24_s20   ;;  %s954_s19 = sphi %s1000_s19, %s1314_s19   ;;  %s950_s18 = sphi %s998_s18, %s1313_s18   ;;  %s946_s17 = sphi %s996_s17, %s1312_s17   ;;  %s942_s16 = sphi %s994_s16, %s1311_s16   ;;  %s938_s15 = sphi %s992_s15, %s1310_s15  }
   0x9   : > { %s43_s23 = sadd.s32 1, %s954_s19  ;;  %s54_s24 = sadd.s32 1, %s946_s17 }
   0xa   : > { %p45_p0 = scmp.ge.s32.totalorder %s43_s23, 2  ;;  %p61_p1 = scmp.ne.s32.totalorder %s946_s17, %s942_s16 }
   0xb   : > { %p62_p2 = scmp.eq.s32.totalorder %s958_s20, 0  ;;  %p67_p3 = scmp.ne.s32.totalorder %s942_s16, %s938_s15 }
   0xc   : > { %s1316_s23 = smov (%p45_p0, %s43_s23), 0  ;;  %p68_p5 = scmp.eq.s32.totalorder %s1023_s21, 0 }
   0xd   : > { %p1035_p4 = por %p62_p2, %p61_p1  ;;  %s49_s26 = ssub.s32 %s954_s19, %s1316_s23 }
   0xe   : > { %p123_p6 = scmp.eq.s32.totalorder %s1023_s21, 1  ;;  %p52_p7 = scmp.eq.s32.totalorder %s49_s26, 0 }
   0xf   : > { %p1043_p8 = por %p68_p5, %p67_p3  ;;  %p129_p10 = scmp.eq.s32.totalorder %s1299_s22, 1 }
  0x10   : > { %p1047_p9 = por %p123_p6, %p61_p1  ;;  %p721_p13 = scmp.lt.s32.totalorder %s958_s20, 2 }
  0x11   : > { %s1054_s29 = scalar_select %p52_p7, %s946_s17, %s54_s24  }
  0x12   : > { %s1302_s28 = scalar_select %p1047_p9, 1, 0 }
  0x13   : > { %p1056_p11 = por %p129_p10, %p67_p3  ;;  %s205_s5 = sand.u32 1, %s946_s17  }
  0x14   : > { %s680_s6 = sshll.u32 %s205_s5, 3  ;;  %s698_s7 = sshll.u32 %s954_s19, 7 }
  0x15   : > { %s1303_s30 = scalar_select %p1056_p11, 1, 0 }
  0x16   : > { %s1067_s10 = scalar_lea.hbm %s1293_s0, %s698_s7  ;;  %s209_s11 = scalar_lea.vmem [#allocation2], %s680_s6 }
  0x17   : > { %s218_s12 = sshll.u32 %s209_s11, 4  ;;  %p1073_p0 = pnand %p721_p13, %p1035_p4  ;;  %s1069_s12 = int_to_ptr.vmem [resolvable:$true] %s218_s12 }
  0x18   : > { %s1078_s14 = scalar_lea.sflag [#allocation3], %s205_s5  ;;  %s786_s24 = scalar_lea.hbm %s1067_s10, 128 }
  0x19   : > { %p787_p2 = scmp.ne.s32.totalorder %s1067_s10, %s786_s24  ;;  %p788_p3 = pneg %p1073_p0 }
  0x1a   : > { %s791_s25 = scalar_lea.hbm %s1293_s0, 256  ;;  %p792_p4 = scmp.lt.u32.totalorder %s1067_s10, %s1293_s0 }
  0x1b   : > { %p789_p5 = pnand %p788_p3, %p787_p2  ;;  %p793_p7 = scmp.lt.u32.totalorder %s791_s25, %s786_s24 }
  0x1c   : > { %p795_p13 = scmp.lt.u32.totalorder %s786_s24, %s1067_s10 }
  0x1d   : > { %p790_p6 = pneg %p789_p5  ;;  %p794_p10 = por %p793_p7, %p792_p4 }
  0x1f   : > { %p796_p12 = por %p795_p13, %p794_p10 }
  0x21   : > { %p797_p1 = pnand %p796_p12, %p790_p6 }
  0x23   : > { %800 = shalt.err (!%p797_p1)
}
  0x24   : > { %s801_s5 = scalar_lea.vmem %s1069_s12, 128  ;;  %s960_s9 = smov [#allocation2]  }
  0x25   : > { %p802_p2 = scmp.ne.s32.totalorder %s1069_s12, %s801_s5  ;;  %s806_s11 = sshll.u32 %s960_s9, 4  ;;  %s807_s11 = int_to_ptr.vmem [resolvable:$false] %s806_s11 }
  0x26   : > { %s808_s26 = scalar_lea.vmem %s807_s11, 256  ;;  %p809_p9 = scmp.lt.s32.totalorder %s1069_s12, %s807_s11 }
  0x27   : > { %p804_p5 = pnand %p802_p2, %p788_p3  ;;  %p810_p4 = scmp.lt.s32.totalorder %s808_s26, %s801_s5 }
  0x29   : > { %p805_p11 = pneg %p804_p5  ;;  %p811_p7 = por %p810_p4, %p809_p9 }
  0x2b   : > { %p812_p10 = pnand %p811_p7, %p805_p11 }
  0x2d   : > { %815 = shalt.err (!%p812_p10)
}
  0x2e   : > { %s961_s24 = smov 32   ;;  %s962_s6 = smov 2  }
  0x2f   : > { %710 = dma.hbm_to_vmem [thread:$0]  (!%p1073_p0), %s1067_s10, 128, %s1069_s12, %s1078_s14, %s961_s24, %s961_s24, %s962_s6  }
  0x30   : > { %p237_p12 = scmp.lt.s32.totalorder %s958_s20, 3  ;;  %p1305_p1 = scmp.ge.s32.totalorder %s958_s20, 1 }
  0x32   : > { %p238_p3 = pnand %p1305_p1, %p237_p12 }
  0x33   : > { %s1110_s25 = sand.u32 (!%p238_p3), 1, %s942_s16  }
  0x34   : > { %241 = sbr.rel (%p238_p3) target bundleno = 187 (0xbb), region = 28  ;;  %s684_s7 = sshll.u32 (!%p238_p3), %s1110_s25, 3 }
  0x35   : > { %s244_s8 = scalar_lea.sflag (!%p238_p3), [#allocation3], %s1110_s25  ;;  %s247_s5 = scalar_lea.vmem (!%p238_p3), [#allocation2], %s684_s7 }
  0x3b   : > { %925 = dma.done.wait (%p1043_p8), %s244_s8, 128  }
  0x3c   : > { %927 = vsyncadd (%p1043_p8), %s244_s8, 4294967168  ;;  %s685_s10 = sshll.u32 %s1110_s25, 2  ;;  %v963_v0 = vmov 0.0   ;;  %s1126_s14 = scalar_lea.vmem [#allocation8], %s1110_s25  ;;  %vm310_vm0 = vcmask 1041408   ;;  %vm406_vm5 = vcmask 1041409  }
  0x3d   : > { %s1119_s12 = scalar_lea.vmem [#allocation6], %s685_s10  ;;  %s1122_s13 = scalar_lea.vmem [#allocation5], %s685_s10  ;;  %303 = vst [vmem:[%s1126_s14] sm:$0x1] %v963_v0  ;;  %v304_v1 = vld [vmem:[%s247_s5] sm:$0x3]  ;;  %vm408_vm6 = vcmask 1042434  }
  0x3e   : > { %302 = vst [vmem:[%s1119_s12] sm:$0xf] %v963_v0  ;;  %301 = vst [vmem:[%s1122_s13] sm:$0xf] %v963_v0  ;;  %v305_v2 = vld [vmem:[%s247_s5 + $0x2] sm:$0x3]  ;;  %v306_v3 = vld [vmem:[%s247_s5 + $0x4] sm:$0x3] }
  0x3f   : > { %v307_v4 = vld [vmem:[%s247_s5 + $0x6] sm:$0x3]  ;;  %v311_v5 = vsel %vm310_vm0, %v304_v1, -inf  ;;  %v312_v6 = vsel %vm310_vm0, %v305_v2, -inf  ;;  %v313_v7 = vsel %vm310_vm0, %v306_v3, -inf  ;;  %p290_p8 = scmp.lt.s32.totalorder %s950_s18, 1 }
  0x40   : > { %v314_v8 = vsel %vm310_vm0, %v307_v4, -inf  ;;  %v315_v9 = vmax.f32 %v311_v5, %v312_v6  ;;  %vm410_vm7 = vcmask 1043459   ;;  %s473_s24 = sand.u32 1, %s1023_s21   ;;  %s693_s6 = sshll.u32 %s950_s18, 6 }
  0x41   : > { %v316_v10 = vmax.f32 %v313_v7, %v314_v8  ;;  %s291_s27 = scalar_select %p290_p8, %s950_s18, 1 }
  0x42   : > { %s506_s7 = sshll.u32 %s1119_s12, 4  ;;  %s492_s21 = sshll.u32 %s1122_s13, 4  ;;  %s1182_s7 = int_to_ptr.vmem [resolvable:$true] %s506_s7  ;;  %s1193_s21 = int_to_ptr.vmem [resolvable:$true] %s492_s21 }
  0x43   : > { %v1134_v11 = vmax.f32 %v315_v9, %v316_v10  ;;  %s295_s26 = scalar_lea.vmem %s1294_s1, %s291_s27  ;;  %s1180_s10 = scalar_lea.hbm %s1296_s3, %s693_s6 }
  0x44   : > { %v308_v20 = vld [vmem:[%s295_s26] sm:$0x1]  ;;  %s1189_s11 = scalar_lea.hbm %s1295_s2, %s693_s6  ;;  %s1195_s26 = scalar_lea.sflag [#allocation7], %s473_s24 }
  0x45   : > { %v318_v12 = vsub.f32 %v304_v1, %v1134_v11  ;;  %v319_v13 = vsub.f32 %v305_v2, %v1134_v11  ;;  %v320_v14 = vsub.f32 %v306_v3, %v1134_v11  ;;  %v321_v15 = vsub.f32 %v307_v4, %v1134_v11  ;;  %s816_s8 = scalar_lea.vmem %s1182_s7, 64  ;;  %p1306_p11 = scmp.ne.s32.totalorder %s1302_s28, 0 }
  0x46   : > { %v309_v21 = vunpack.c.0.s8 %v308_v20  ;;  %p817_p9 = scmp.ne.s32.totalorder %s1182_s7, %s816_s8  ;;  %s964_s5 = smov [#allocation6]  }
  0x47   : > { %v322_v16 = vmul.f32 1.442695, %v318_v12  ;;  %v324_v17 = vmul.f32 1.442695, %v319_v13  ;;  %v326_v18 = vmul.f32 1.442695, %v320_v14 }
  0x48   : > { %v328_v19 = vmul.f32 1.442695, %v321_v15  ;;  %vm342_vm1 = vcmp.eq.s32.totalorder %v309_v21, 0  ;;  %vm343_vm2 = vcmp.eq.s32.totalorder %v309_v21, 1  ;;  %vm344_vm3 = vcmp.eq.s32.totalorder %v309_v21, 2  ;;  %p818_p0 = pnand %p817_p9, %p1306_p11  ;;  %s820_s22 = sshll.u32 %s964_s5, 4  ;;  %s821_s22 = int_to_ptr.vmem [resolvable:$false] %s820_s22 }
  0x49   : > { %774 = vpow2.f32 %v322_v16  ;;  %v687_v28 = vsel %vm342_vm1, 1.0, %v963_v0  ;;  %v688_v29 = vsel %vm343_vm2, 1.0, %v963_v0  ;;  %v689_v37 = vsel %vm344_vm3, 1.0, %v963_v0  ;;  %s822_s27 = scalar_lea.vmem %s821_s22, 128  ;;  %p823_p13 = scmp.lt.s32.totalorder %s1182_s7, %s821_s22 }
  0x4a   : > { %776 = vpow2.f32 %v324_v17  ;;  %v354_v34 = vmul.f32 %v687_v28, %v304_v1  ;;  %v355_v35 = vmul.f32 %v688_v29, %v305_v2  ;;  %vm345_vm4 = vcmp.eq.s32.totalorder %v309_v21, 3  ;;  %p819_p6 = pneg %p818_p0  ;;  %p824_p2 = scmp.lt.s32.totalorder %s822_s27, %s816_s8 }
  0x4b   : > { %778 = vpow2.f32 %v326_v18  ;;  %v356_v38 = vmul.f32 %v689_v37, %v306_v3  ;;  %v690_v41 = vsel %vm345_vm4, 1.0, %v963_v0 }
  0x4c   : > { %780 = vpow2.f32 %v328_v19  ;;  %v358_v39 = vsel %vm310_vm0, %v354_v34, 0.0  ;;  %v359_v40 = vsel %vm310_vm0, %v355_v35, 0.0  ;;  %v357_v43 = vmul.f32 %v690_v41, %v307_v4  ;;  %p825_p5 = por %p824_p2, %p823_p13 }
  0x4d   : > { %v360_v42 = vadd.f32 %v359_v40, %v358_v39  ;;  %v361_v44 = vsel %vm310_vm0, %v356_v38, 0.0 }
  0x4e   : > { %v363_v46 = vsel %vm310_vm0, %v357_v43, 0.0  ;;  %p826_p4 = pnand %p825_p5, %p819_p6 }
  0x4f   : > { %v362_v45 = vadd.f32 %v361_v44, %v360_v42 }
  0x51   : > { %v1152_v53 = vadd.f32 %v363_v46, %v362_v45 }
  0x53   : > { %v775_v22 = vpop.eup %774 }
  0x54   : > { %v777_v23 = vpop.eup %776  ;;  %v330_v24 = vsel %vm310_vm0, %v775_v22, 0.0 }
  0x55   : > { %v779_v25 = vpop.eup %778  ;;  %v331_v26 = vsel %vm310_vm0, %v777_v23, 0.0 }
  0x56   : > { %v781_v27 = vpop.eup %780  ;;  %v332_v30 = vadd.f32 %v331_v26, %v330_v24  ;;  %v333_v31 = vsel %vm310_vm0, %v779_v25, 0.0 }
  0x57   : > { %v335_v32 = vsel %vm310_vm0, %v781_v27, 0.0 }
  0x58   : > { %v334_v33 = vadd.f32 %v333_v31, %v332_v30 }
  0x5a   : > { %v336_v36 = vadd.f32 %v335_v32, %v334_v33 }
  0x5c   : > { %782 = vrcp.f32 %v336_v36 }
  0x5d   : > { %784 = vlog2.f32 %v336_v36 }
  0x66   : > { %v783_v47 = vpop.eup %782 }
  0x67   : > { %v785_v48 = vpop.eup %784  ;;  %v338_v49 = vmul.f32 %v783_v47, %v775_v22  ;;  %v339_v50 = vmul.f32 %v783_v47, %v777_v23  ;;  %v340_v51 = vmul.f32 %v783_v47, %v779_v25  ;;  %v341_v52 = vmul.f32 %v783_v47, %v781_v27 }
  0x68   : > { %v1154_v54 = vmul.f32 0.6931472, %v785_v48 }
  0x69   : > { %v416_v55 = vadd.f32 %v687_v28, %v338_v49  ;;  %v417_v56 = vadd.f32 %v688_v29, %v339_v50  ;;  %v418_v57 = vadd.f32 %v689_v37, %v340_v51  ;;  %v419_v58 = vadd.f32 %v690_v41, %v341_v52 }
  0x6a   : > { %v370_v59 = vmul.f32 %v687_v28, %v338_v49  ;;  %v371_v60 = vmul.f32 %v688_v29, %v339_v50  ;;  %v372_v61 = vmul.f32 %v689_v37, %v340_v51  ;;  %v373_v62 = vmul.f32 %v690_v41, %v341_v52  ;;  %v415_v52 = vld [vmem:[%s1119_s12] sm:$0xf] }
  0x6b   : > { %v420_v63 = vsel %vm310_vm0, %v416_v55, 0.0  ;;  %v427_v0 = vsel %vm310_vm0, %v417_v56, 0.0  ;;  %v434_v1 = vsel %vm310_vm0, %v418_v57, 0.0  ;;  %v441_v2 = vsel %vm310_vm0, %v419_v58, 0.0 }
  0x6c   : > { %v421_v3 = vrot.slane %v420_v63, 4  ;;  %v428_v4 = vrot.slane %v427_v0, 4  ;;  %v435_v5 = vrot.slane %v434_v1, 4  ;;  %v442_v6 = vrot.slane %v441_v2, 4 }
  0x6d   : > { %v374_v7 = vsel %vm310_vm0, %v370_v59, 0.0  ;;  %v381_v8 = vsel %vm310_vm0, %v371_v60, 0.0  ;;  %v388_v9 = vsel %vm310_vm0, %v372_v61, 0.0  ;;  %v395_v10 = vsel %vm310_vm0, %v373_v62, 0.0 }
  0x6e   : > { %v422_v12 = vadd.f32 %v421_v3, %v420_v63  ;;  %v429_v13 = vadd.f32 %v428_v4, %v427_v0  ;;  %v436_v14 = vadd.f32 %v435_v5, %v434_v1  ;;  %v443_v15 = vadd.f32 %v442_v6, %v441_v2  ;;  %v369_v1 = vld [vmem:[%s1122_s13] sm:$0xf] }
  0x6f   : > { %v375_v16 = vrot.slane %v374_v7, 4  ;;  %v382_v17 = vrot.slane %v381_v8, 4  ;;  %v389_v18 = vrot.slane %v388_v9, 4  ;;  %v396_v19 = vrot.slane %v395_v10, 4 }
  0x70   : > { %v423_v20 = vrot.slane %v422_v12, 2  ;;  %v430_v21 = vrot.slane %v429_v13, 2  ;;  %v437_v22 = vrot.slane %v436_v14, 2  ;;  %v444_v23 = vrot.slane %v443_v15, 2 }
  0x71   : > { %v376_v24 = vadd.f32 %v375_v16, %v374_v7  ;;  %v383_v25 = vadd.f32 %v382_v17, %v381_v8  ;;  %v390_v26 = vadd.f32 %v389_v18, %v388_v9  ;;  %v397_v27 = vadd.f32 %v396_v19, %v395_v10 }
  0x72   : > { %v424_v28 = vadd.f32 %v423_v20, %v422_v12  ;;  %v431_v29 = vadd.f32 %v430_v21, %v429_v13  ;;  %v438_v30 = vadd.f32 %v437_v22, %v436_v14  ;;  %v445_v31 = vadd.f32 %v444_v23, %v443_v15 }
  0x73   : > { %v377_v32 = vrot.slane %v376_v24, 2  ;;  %v384_v33 = vrot.slane %v383_v25, 2  ;;  %v391_v34 = vrot.slane %v390_v26, 2  ;;  %v398_v35 = vrot.slane %v397_v27, 2 }
  0x74   : > { %v425_v36 = vrot.slane %v424_v28, 1  ;;  %v432_v37 = vrot.slane %v431_v29, 1  ;;  %v439_v38 = vrot.slane %v438_v30, 1  ;;  %v446_v39 = vrot.slane %v445_v31, 1 }
  0x75   : > { %v378_v40 = vadd.f32 %v377_v32, %v376_v24  ;;  %v385_v41 = vadd.f32 %v384_v33, %v383_v25  ;;  %v392_v42 = vadd.f32 %v391_v34, %v390_v26  ;;  %v399_v43 = vadd.f32 %v398_v35, %v397_v27 }
  0x76   : > { %v426_v44 = vadd.f32 %v425_v36, %v424_v28  ;;  %v433_v45 = vadd.f32 %v432_v37, %v431_v29  ;;  %v440_v46 = vadd.f32 %v439_v38, %v438_v30  ;;  %v447_v47 = vadd.f32 %v446_v39, %v445_v31 }
  0x77   : > { %v379_v48 = vrot.slane %v378_v40, 1  ;;  %v386_v49 = vrot.slane %v385_v41, 1  ;;  %v393_v50 = vrot.slane %v392_v42, 1  ;;  %v400_v51 = vrot.slane %v399_v43, 1 }
  0x78   : > { %v452_v55 = vsel %vm406_vm5, %v433_v45, %v426_v44  ;;  %v367_v56 = vadd.f32 %v1154_v54, %v1134_v11 }
  0x79   : > { %v453_v57 = vsel %vm408_vm6, %v440_v46, %v452_v55  ;;  %v380_v58 = vadd.f32 %v379_v48, %v378_v40  ;;  %v387_v59 = vadd.f32 %v386_v49, %v385_v41  ;;  %v394_v60 = vadd.f32 %v393_v50, %v392_v42 }
  0x7a   : > { %v454_v61 = vsel %vm410_vm7, %v447_v47, %v453_v57  ;;  %v401_v62 = vadd.f32 %v400_v51, %v399_v43  ;;  %v368_v63 = vsub.f32 %v367_v56, %v1152_v53 }
  0x7b   : > { %v456_v0 = vadd.f32 %v454_v61, %v415_v52  ;;  %v407_v2 = vsel %vm406_vm5, %v387_v59, %v380_v58 }
  0x7c   : > { %v409_v11 = vsel %vm408_vm6, %v394_v60, %v407_v2  ;;  %v459_v54 = vsel %vm310_vm0, %v368_v63, 0.0 }
  0x7d   : > { %457 = vst [vmem:[%s1119_s12] sm:$0xf] %v456_v0  ;;  %v411_v53 = vsel %vm410_vm7, %v401_v62, %v409_v11  ;;  %v460_v3 = vrot.slane %v459_v54, 4 }
  0x7e   : > { %v413_v4 = vadd.f32 %v411_v53, %v369_v1 }
  0x7f   : > { %829 = shalt.err (!%p826_p4)
}
  0x80   : > { %s830_s12 = scalar_lea.hbm %s1180_s10, 64  ;;  %s834_s9 = scalar_lea.hbm %s1296_s3, 128 }
  0x81   : > { %p831_p7 = scmp.ne.s32.totalorder %s1180_s10, %s830_s12  ;;  %p835_p1 = scmp.lt.u32.totalorder %s1180_s10, %s1296_s3 }
  0x82   : > { %p836_p3 = scmp.lt.u32.totalorder %s834_s9, %s830_s12  ;;  %p838_p9 = scmp.lt.u32.totalorder %s830_s12, %s1180_s10 }
  0x83   : > { %p832_p10 = pnand %p831_p7, %p1306_p11 }
  0x84   : > { %p837_p8 = por %p836_p3, %p835_p1 }
  0x85   : > { %p833_p12 = pneg %p832_p10 }
  0x86   : > { %p839_p0 = por %p838_p9, %p837_p8 }
  0x88   : > { %p840_p6 = pnand %p839_p0, %p833_p12 }
  0x8a   : > { %843 = shalt.err (!%p840_p6)
}
  0x8b   : > { %702 = dma.vmem_to_hbm [thread:$0]  (%p1306_p11), %s1182_s7, 64, %s1180_s10, %s1195_s26   ;;  %v461_v5 = vadd.f32 %v460_v3, %v459_v54  ;;  %414 = vst [vmem:[%s1122_s13] sm:$0xf] %v413_v4 }
  0x8c   : > { %s469_s8 = scalar_lea.sflag [#allocation4], %s1110_s25  ;;  %s844_s27 = scalar_lea.vmem %s1193_s21, 64 }
  0x8d   : > { %v462_v6 = vrot.slane %v461_v5, 2  ;;  %p845_p13 = scmp.ne.s32.totalorder %s1193_s21, %s844_s27  ;;  %s965_s12 = smov [#allocation5]  }
  0x8e   : > { %s848_s24 = sshll.u32 %s965_s12, 4  ;;  %s849_s24 = int_to_ptr.vmem [resolvable:$false] %s848_s24 }
  0x8f   : > { %p846_p2 = pnand %p845_p13, %p1306_p11  ;;  %s850_s6 = scalar_lea.vmem %s849_s24, 128 }
  0x90   : > { %p851_p4 = scmp.lt.s32.totalorder %s1193_s21, %s849_s24  ;;  %p852_p7 = scmp.lt.s32.totalorder %s850_s6, %s844_s27 }
  0x91   : > { %p847_p5 = pneg %p846_p2 }
  0x92   : > { %p853_p10 = por %p852_p7, %p851_p4 }
  0x94   : > { %p854_p12 = pnand %p853_p10, %p847_p5 }
  0x96   : > { %857 = shalt.err (!%p854_p12)
}
  0x97   : > { %s858_s25 = scalar_lea.hbm %s1189_s11, 64  ;;  %s862_s10 = scalar_lea.hbm %s1295_s2, 128 }
  0x98   : > { %p859_p1 = scmp.ne.s32.totalorder %s1189_s11, %s858_s25  ;;  %p863_p9 = scmp.lt.u32.totalorder %s1189_s11, %s1295_s2 }
  0x99   : > { %p864_p0 = scmp.lt.u32.totalorder %s862_s10, %s858_s25  ;;  %p866_p13 = scmp.lt.u32.totalorder %s858_s25, %s1189_s11 }
  0x9a   : > { %p860_p3 = pnand %p859_p1, %p1306_p11 }
  0x9b   : > { %p865_p6 = por %p864_p0, %p863_p9 }
  0x9c   : > { %p861_p8 = pneg %p860_p3 }
  0x9d   : > { %p867_p2 = por %p866_p13, %p865_p6 }
  0x9f   : > { %p868_p5 = pnand %p867_p2, %p861_p8 }
  0xa1   : > { %871 = shalt.err (!%p868_p5)
}
  0xa2   : > { %701 = dma.vmem_to_hbm [thread:$0]  (%p1306_p11), %s1193_s21, 64, %s1189_s11, %s469_s8   ;;  %v463_v7 = vadd.f32 %v462_v6, %v461_v5  ;;  %v458_v9 = vld [vmem:[%s1126_s14] sm:$0x1] }
  0xa3   : > { %s520_s22 = sshll.u32 %s1126_s14, 4  ;;  %s695_s27 = sshll.u32 %s950_s18, 4  ;;  %s1245_s22 = int_to_ptr.vmem [resolvable:$true] %s520_s22 }
  0xa4   : > { %v464_v8 = vrot.slane %v463_v7, 1  ;;  %s518_s6 = scalar_lea.hbm %s1297_s4, %s695_s27  ;;  %s872_s25 = scalar_lea.vmem %s1245_s22, 16 }
  0xa5   : > { %p873_p4 = scmp.ne.s32.totalorder %s1245_s22, %s872_s25  ;;  %s966_s21 = smov [#allocation8]  }
  0xa6   : > { %v465_v10 = vadd.f32 %v464_v8, %v463_v7  ;;  %s876_s11 = sshll.u32 %s966_s21, 4  ;;  %s877_s11 = int_to_ptr.vmem [resolvable:$false] %s876_s11 }
  0xa7   : > { %p874_p7 = pnand %p873_p4, %p1306_p11  ;;  %s878_s18 = scalar_lea.vmem %s877_s11, 32 }
  0xa8   : > { %v466_v12 = vadd.f32 %v465_v10, %v458_v9  ;;  %p879_p12 = scmp.lt.s32.totalorder %s1245_s22, %s877_s11  ;;  %p880_p1 = scmp.lt.s32.totalorder %s878_s18, %s872_s25 }
  0xa9   : > { %p875_p10 = pneg %p874_p7 }
  0xaa   : > { %467 = vst [vmem:[%s1126_s14] sm:$0x1] %v466_v12  ;;  %p881_p3 = por %p880_p1, %p879_p12 }
  0xac   : > { %p882_p8 = pnand %p881_p3, %p875_p10 }
  0xae   : > { %885 = shalt.err (!%p882_p8)
}
  0xaf   : > { %s886_s8 = scalar_lea.hbm %s518_s6, 16  ;;  %s890_s7 = scalar_lea.hbm %s1297_s4, 32 }
  0xb0   : > { %p887_p9 = scmp.ne.s32.totalorder %s518_s6, %s886_s8  ;;  %p891_p13 = scmp.lt.u32.totalorder %s518_s6, %s1297_s4 }
  0xb1   : > { %p892_p2 = scmp.lt.u32.totalorder %s890_s7, %s886_s8  ;;  %p894_p4 = scmp.lt.u32.totalorder %s886_s8, %s518_s6 }
  0xb2   : > { %p888_p0 = pnand %p887_p9, %p1306_p11 }
  0xb3   : > { %p893_p5 = por %p892_p2, %p891_p13 }
  0xb4   : > { %p889_p6 = pneg %p888_p0 }
  0xb5   : > { %p895_p7 = por %p894_p4, %p893_p5 }
  0xb7   : > { %p896_p10 = pnand %p895_p7, %p889_p6 }
  0xb9   : > { %899 = shalt.err (!%p896_p10)
}
  0xba   : > { %703 = dma.vmem_to_hbm [thread:$0]  (%p1306_p11), %s1245_s22, 16, %s518_s6, %s1195_s26  }
  0xbb PF: > { %s532_s5 = sand.u32 1, %s938_s15   ;;  %p1307_p12 = scmp.ne.s32.totalorder %s1303_s30, 0 }
  0xbc   : > { %p1308_p1 = scmp.ge.s32.totalorder %s958_s20, 2  ;;  %s533_s27 = scalar_lea.sflag [#allocation4], %s532_s5 }
  0xbe   : > { %p712_p3 = pnand %p1308_p1, %p1307_p12 }
  0xc0   : > { %929 = dma.done.wait (!%p712_p3), %s533_s27, 64  }
  0xc1   : > { %931 = vsyncadd (!%p712_p3), %s533_s27, 4294967232  ;;  %s1309_s12 = sadd.s32 4294967294, %s958_s20  }
  0xc2   : > { %s541_s24 = sand.u32 1, %s1309_s12  }
  0xc3   : > { %s542_s25 = scalar_lea.sflag [#allocation7], %s541_s24 }
  0xc4   : > { %933 = dma.done.wait (!%p712_p3), %s542_s25, 80  }
  0xc5   : > { %935 = vsyncadd (!%p712_p3), %s542_s25, 4294967216  ;;  %s24_s20 = sadd.s32 1, %s958_s20   ;;  %s1310_s15 = smov %s942_s16 }
  0xc6   : > { %p21_p11 = scmp.ge.s32.totalorder %s24_s20, 4   ;;  %s1311_s16 = smov %s946_s17 }
  0xc7   : > { %s1312_s17 = smov %s1054_s29  ;;  %s1313_s18 = smov %s954_s19 }
  0xc8   : > { %s1314_s19 = smov %s1316_s23  ;;  %23 = sbr.rel (!%p21_p11) target bundleno = 8 (0x8), region = 112 }
  0xcf   :  { %555 = vsyncpa [#allocation3], 1 }
  0xd0   :  { %557 = vsyncpa [#allocation3 + $0x1], 1 }
  0xd1   :  { %558 = vsyncpa [#allocation4], 1 }
  0xd2   :  { %560 = vsyncpa [#allocation4 + $0x1], 1 }
  0xd3   :  { %561 = vsyncpa [#allocation7], 1 }
  0xd4   :  { %563 = vsyncpa [#allocation7 + $0x1], 1 }

</bundles_post_ra>
